<compile_context>
chip_gen: v5e
topology: v5e:2x2
jax: 0.10.0
libtpu: 0.0.40
codegen_flags: <defaults>
</compile_context>

<pallas_src>
import jax
import jax.numpy as jnp
from jax import lax
from jax.experimental import pallas as pl
from jax.experimental.pallas import tpu as pltpu


def _skipgram_kernel(idx_u_ref, idx_v_ref,     # SMEM scalar-prefetch, [R_pad] int32
                     emb_u_hbm, emb_v_hbm,     # HBM (pl.ANY) refs, [V, D] float32
                     out_ref,                  # VMEM out block, [1, R_TILE] float32
                     u_buf, v_buf,             # VMEM scratch, [R_TILE, D] float32
                     sem):                     # DMA semaphores, shape (2,)
    r_tile, d = u_buf.shape
    base = pl.program_id(0) * r_tile           # element offset into the flat index arrays

    # Issue one row-gather DMA per (u, v) pair for this tile.  Indices come
    # from SMEM; rows are copied straight from the HBM tables into VMEM.
    @pl.loop(0, r_tile)
    def _issue(r):
        iu = idx_u_ref[base + r]
        iv = idx_v_ref[base + r]
        pltpu.make_async_copy(emb_u_hbm.at[pl.ds(iu, 1), :],
                              u_buf.at[pl.ds(r, 1), :], sem.at[0]).start()
        pltpu.make_async_copy(emb_v_hbm.at[pl.ds(iv, 1), :],
                              v_buf.at[pl.ds(r, 1), :], sem.at[1]).start()

    # Wait for all row copies (one row-sized wait per issued copy; all copies
    # on a semaphore have identical shape, so the byte accounting matches).
    @pl.loop(0, r_tile)
    def _drain(r):
        pltpu.make_async_copy(emb_u_hbm.at[pl.ds(0, 1), :],
                              u_buf.at[pl.ds(r, 1), :], sem.at[0]).wait()
        pltpu.make_async_copy(emb_v_hbm.at[pl.ds(0, 1), :],
                              v_buf.at[pl.ds(r, 1), :], sem.at[1]).wait()

    # Per-pair dot product: f32 VPU multiply, then contract D against a ones
    # vector on the MXU.  Contracting the last dim of both operands (q·kT
    # pattern) yields a lane-dense [*, R_TILE] row directly.
    prod = u_buf[...] * v_buf[...]                                  # [R_TILE, D] f32
    ones = jnp.ones((8, d), jnp.float32)
    rows = lax.dot_general(ones, prod,
                           dimension_numbers=(((1,), (1,)), ((), ())),
                           preferred_element_type=jnp.float32)      # [8, R_TILE]
    out_ref[...] = rows[0:1, :]                                     # [1, R_TILE]


def skipgram_forward(x_idx, emb_u, emb_v, *, max_rows_per_tile=128):
    """x_idx: int [B, N, 2]; emb_u / emb_v: float32 [V, D]. Returns f32 [B, N]."""
    B, N, two = x_idx.shape
    assert two == 2
    V, D = emb_u.shape
    assert emb_v.shape == (V, D)
    emb_u = emb_u.astype(jnp.float32)
    emb_v = emb_v.astype(jnp.float32)

    R = B * N
    # One lane-dense tile if R is small; otherwise 128 pairs per grid step
    # (keeps the output blocks 128-lane aligned and the in-flight DMA count low).
    r_tile = R if R <= max_rows_per_tile else max_rows_per_tile
    num_tiles = pl.cdiv(R, r_tile)
    r_pad = num_tiles * r_tile

    idx = x_idx.reshape(R, 2).astype(jnp.int32)
    idx_u = idx[:, 0]
    idx_v = idx[:, 1]
    if r_pad != R:
        pad = jnp.zeros((r_pad - R,), jnp.int32)    # padded rows gather row 0, discarded below
        idx_u = jnp.concatenate([idx_u, pad])
        idx_v = jnp.concatenate([idx_v, pad])

    out_row = pl.pallas_call(
        _skipgram_kernel,
        out_shape=jax.ShapeDtypeStruct((1, r_pad), jnp.float32),
        grid_spec=pltpu.PrefetchScalarGridSpec(
            num_scalar_prefetch=2,                       # idx_u, idx_v -> SMEM
            grid=(num_tiles,),
            in_specs=[
                pl.BlockSpec(memory_space=pl.ANY),       # emb_u stays in HBM
                pl.BlockSpec(memory_space=pl.ANY),       # emb_v stays in HBM
            ],
            out_specs=pl.BlockSpec((1, r_tile), lambda i, idx_u, idx_v: (0, i)),
            scratch_shapes=[
                pltpu.VMEM((r_tile, D), jnp.float32),    # gathered u rows
                pltpu.VMEM((r_tile, D), jnp.float32),    # gathered v rows
                pltpu.SemaphoreType.DMA((2,)),           # one sem per table
            ],
        ),
        compiler_params=pltpu.CompilerParams(
            dimension_semantics=("parallel",),           # shard row tiles across TCs (v7x)
        ),
    )(idx_u, idx_v, emb_u, emb_v)

    return out_row[0, :R].reshape(B, N)


def _reference_forward(x_idx, emb_u, emb_v):
    # Pure-JAX reference of the PyTorch module's forward.
    u = jnp.take(emb_u, x_idx[:, :, 0], axis=0)   # [B, N, D]
    v = jnp.take(emb_v, x_idx[:, :, 1], axis=0)   # [B, N, D]
    return jnp.sum(u * v, axis=-1)                # [B, N]


if __name__ == "__main__":
    vocab_size = 128
    embedding_dim = 64
    B = 30          # batch of (center, context) pair groups -> R = 240 (exercises padding)
    N = 8           # 1 positive + 7 negative samples per batch element

    key = jax.random.PRNGKey(0)
    k_idx, k_u, k_v = jax.random.split(key, 3)

    # Deterministic "weights": nn.Embedding default init is N(0, 1).
    emb_u = jax.random.normal(k_u, (vocab_size, embedding_dim), dtype=jnp.float32)
    emb_v = jax.random.normal(k_v, (vocab_size, embedding_dim), dtype=jnp.float32)

    # Deterministic integer inputs, matching PyTorch LongTensor [B, N, 2].
    x_idx = jax.random.randint(k_idx, (B, N, 2), 0, vocab_size, dtype=jnp.int32)

    out = skipgram_forward(x_idx, emb_u, emb_v)
    out = jax.block_until_ready(out)

    ref = _reference_forward(x_idx, emb_u, emb_v)
    assert out.shape == (B, N)
    assert jnp.allclose(out, ref, atol=1e-4, rtol=1e-4), float(jnp.max(jnp.abs(out - ref)))

    print("KERNEL_OK")
</pallas_src>

<mosaic_0001>
module attributes {stable_mosaic.version = 11 : i64} {
  func.func @_skipgram_kernel(%arg0: i32, %arg1: memref<256xi32, #tpu.memory_space<smem>>, %arg2: memref<256xi32, #tpu.memory_space<smem>>, %arg3: memref<128x64xf32, #tpu.memory_space<any>>, %arg4: memref<128x64xf32, #tpu.memory_space<any>>, %arg5: memref<1x128xf32, #tpu.memory_space<vmem>>, %arg6: memref<128x64xf32, #tpu.memory_space<vmem>>, %arg7: memref<128x64xf32, #tpu.memory_space<vmem>>, %arg8: memref<2x!tpu.dma_semaphore, #tpu.memory_space<semaphore_mem>>) attributes {dimension_semantics = [#tpu.dimension_semantics<parallel>], iteration_bounds = array<i64: 2>, scalar_prefetch = 2 : i64, scratch_operands = 3 : i64, tpu.core_type = #tpu.core_type<tc>, window_params = [{}, {}, {transform_indices = @transform_2, window_bounds = array<i64: 1, 128>}]} {
    %c128_i32 = arith.constant 128 : i32
    %0 = arith.muli %arg0, %c128_i32 : i32
    %c0_i32 = arith.constant 0 : i32
    %c128_i32_0 = arith.constant 128 : i32
    %1 = arith.addi %c0_i32, %c128_i32_0 : i32
    %c1_i32 = arith.constant 1 : i32
    scf.for %arg9 = %c0_i32 to %1 step %c1_i32  : i32 {
      %c1_i32_12 = arith.constant 1 : i32
      %10 = arith.muli %arg9, %c1_i32_12 : i32
      %c0_i32_13 = arith.constant 0 : i32
      %11 = arith.addi %c0_i32_13, %10 : i32
      %12 = arith.addi %0, %11 : i32
      %13 = arith.index_cast %12 : i32 to index
      %14 = memref.load %arg1[%13] : memref<256xi32, #tpu.memory_space<smem>>
      %15 = arith.addi %0, %11 : i32
      %16 = arith.index_cast %15 : i32 to index
      %17 = memref.load %arg2[%16] : memref<256xi32, #tpu.memory_space<smem>>
      %c0_i32_14 = arith.constant 0 : i32
      %c0_i32_15 = arith.constant 0 : i32
      %18 = tpu.memref_slice %arg3[%14, %c0_i32_15] : memref<128x64xf32, #tpu.memory_space<any>> -> memref<1x64xf32, #tpu.memory_space<any>>
      %c0_i32_16 = arith.constant 0 : i32
      %19 = tpu.memref_slice %arg6[%11, %c0_i32_16] : memref<128x64xf32, #tpu.memory_space<vmem>> -> memref<1x64xf32, #tpu.memory_space<vmem>>
      %20 = tpu.memref_slice %arg8[%c0_i32_14] : memref<2x!tpu.dma_semaphore, #tpu.memory_space<semaphore_mem>> -> memref<1x!tpu.dma_semaphore, #tpu.memory_space<semaphore_mem>>
      %21 = tpu.memref_squeeze %20 : memref<1x!tpu.dma_semaphore, #tpu.memory_space<semaphore_mem>> -> memref<!tpu.dma_semaphore, #tpu.memory_space<semaphore_mem>>
      tpu.enqueue_dma source(%18 : memref<1x64xf32, #tpu.memory_space<any>>) target(%19 : memref<1x64xf32, #tpu.memory_space<vmem>>) target_semaphore(%21 : memref<!tpu.dma_semaphore, #tpu.memory_space<semaphore_mem>>)
      %c1_i32_17 = arith.constant 1 : i32
      %c0_i32_18 = arith.constant 0 : i32
      %22 = tpu.memref_slice %arg4[%17, %c0_i32_18] : memref<128x64xf32, #tpu.memory_space<any>> -> memref<1x64xf32, #tpu.memory_space<any>>
      %c0_i32_19 = arith.constant 0 : i32
      %23 = tpu.memref_slice %arg7[%11, %c0_i32_19] : memref<128x64xf32, #tpu.memory_space<vmem>> -> memref<1x64xf32, #tpu.memory_space<vmem>>
      %24 = tpu.memref_slice %arg8[%c1_i32_17] : memref<2x!tpu.dma_semaphore, #tpu.memory_space<semaphore_mem>> -> memref<1x!tpu.dma_semaphore, #tpu.memory_space<semaphore_mem>>
      %25 = tpu.memref_squeeze %24 : memref<1x!tpu.dma_semaphore, #tpu.memory_space<semaphore_mem>> -> memref<!tpu.dma_semaphore, #tpu.memory_space<semaphore_mem>>
      tpu.enqueue_dma source(%22 : memref<1x64xf32, #tpu.memory_space<any>>) target(%23 : memref<1x64xf32, #tpu.memory_space<vmem>>) target_semaphore(%25 : memref<!tpu.dma_semaphore, #tpu.memory_space<semaphore_mem>>)
    }
    %c128_i32_1 = arith.constant 128 : i32
    %c0_i32_2 = arith.constant 0 : i32
    %c128_i32_3 = arith.constant 128 : i32
    %2 = arith.addi %c0_i32_2, %c128_i32_3 : i32
    %c1_i32_4 = arith.constant 1 : i32
    scf.for %arg9 = %c0_i32_2 to %2 step %c1_i32_4  : i32 {
      %c1_i32_12 = arith.constant 1 : i32
      %10 = arith.muli %arg9, %c1_i32_12 : i32
      %c0_i32_13 = arith.constant 0 : i32
      %11 = arith.addi %c0_i32_13, %10 : i32
      %c0_i32_14 = arith.constant 0 : i32
      %c0_i32_15 = arith.constant 0 : i32
      %c0_i32_16 = arith.constant 0 : i32
      %12 = tpu.memref_slice %arg3[%c0_i32_15, %c0_i32_16] : memref<128x64xf32, #tpu.memory_space<any>> -> memref<1x64xf32, #tpu.memory_space<any>>
      %c0_i32_17 = arith.constant 0 : i32
      %13 = tpu.memref_slice %arg6[%11, %c0_i32_17] : memref<128x64xf32, #tpu.memory_space<vmem>> -> memref<1x64xf32, #tpu.memory_space<vmem>>
      %14 = tpu.memref_slice %arg8[%c0_i32_14] : memref<2x!tpu.dma_semaphore, #tpu.memory_space<semaphore_mem>> -> memref<1x!tpu.dma_semaphore, #tpu.memory_space<semaphore_mem>>
      %15 = tpu.memref_squeeze %14 : memref<1x!tpu.dma_semaphore, #tpu.memory_space<semaphore_mem>> -> memref<!tpu.dma_semaphore, #tpu.memory_space<semaphore_mem>>
      tpu.wait_dma2 semaphore(%15 : memref<!tpu.dma_semaphore, #tpu.memory_space<semaphore_mem>>) src(%12 : memref<1x64xf32, #tpu.memory_space<any>>) dst(%13 : memref<1x64xf32, #tpu.memory_space<vmem>>)
      %c1_i32_18 = arith.constant 1 : i32
      %c0_i32_19 = arith.constant 0 : i32
      %c0_i32_20 = arith.constant 0 : i32
      %16 = tpu.memref_slice %arg4[%c0_i32_19, %c0_i32_20] : memref<128x64xf32, #tpu.memory_space<any>> -> memref<1x64xf32, #tpu.memory_space<any>>
      %c0_i32_21 = arith.constant 0 : i32
      %17 = tpu.memref_slice %arg7[%11, %c0_i32_21] : memref<128x64xf32, #tpu.memory_space<vmem>> -> memref<1x64xf32, #tpu.memory_space<vmem>>
      %18 = tpu.memref_slice %arg8[%c1_i32_18] : memref<2x!tpu.dma_semaphore, #tpu.memory_space<semaphore_mem>> -> memref<1x!tpu.dma_semaphore, #tpu.memory_space<semaphore_mem>>
      %19 = tpu.memref_squeeze %18 : memref<1x!tpu.dma_semaphore, #tpu.memory_space<semaphore_mem>> -> memref<!tpu.dma_semaphore, #tpu.memory_space<semaphore_mem>>
      tpu.wait_dma2 semaphore(%19 : memref<!tpu.dma_semaphore, #tpu.memory_space<semaphore_mem>>) src(%16 : memref<1x64xf32, #tpu.memory_space<any>>) dst(%17 : memref<1x64xf32, #tpu.memory_space<vmem>>)
    }
    %c128_i32_5 = arith.constant 128 : i32
    %c0 = arith.constant 0 : index
    %c0_6 = arith.constant 0 : index
    %3 = vector.load %arg6[%c0, %c0_6] : memref<128x64xf32, #tpu.memory_space<vmem>>, vector<128x64xf32>
    %c0_7 = arith.constant 0 : index
    %c0_8 = arith.constant 0 : index
    %4 = vector.load %arg7[%c0_7, %c0_8] : memref<128x64xf32, #tpu.memory_space<vmem>>, vector<128x64xf32>
    %5 = arith.mulf %3, %4 : vector<128x64xf32>
    %cst = arith.constant 1.000000e+00 : f32
    %6 = vector.broadcast %cst : f32 to vector<8x64xf32>
    %cst_9 = arith.constant dense<0.000000e+00> : vector<8x128xf32>
    %7 = tpu.matmul %6, %5, %cst_9 {dimension_numbers = #tpu.dot_dimension_numbers<[1], [1], [0], [0], [0, 0, 1, 0], [], []>} : vector<8x64xf32>, vector<128x64xf32>, vector<8x128xf32> -> vector<8x128xf32>
    %8 = vector.extract_strided_slice %7 {offsets = [0, 0], sizes = [1, 128], strides = [1, 1]} : vector<8x128xf32> to vector<1x128xf32>
    %c0_10 = arith.constant 0 : index
    %c0_11 = arith.constant 0 : index
    %9 = vector.load %arg5[%c0_10, %c0_11] : memref<1x128xf32, #tpu.memory_space<vmem>>, vector<1x128xf32>
    tpu.vector_store %arg5[%c0_10, %c0_11], %8 {strides = array<i32>} : memref<1x128xf32, #tpu.memory_space<vmem>>, vector<1x128xf32>,
    return
  }
  func.func @transform_2(%arg0: i32, %arg1: memref<256xi32, #tpu.memory_space<smem>>, %arg2: memref<256xi32, #tpu.memory_space<smem>>) -> (i32, i32) {
    %c0_i32 = arith.constant 0 : i32
    %c0_i32_0 = arith.constant 0 : i32
    return %c0_i32, %arg0 : i32, i32
  }
}

</mosaic_0001>

<bundles_post_ra>
// kernel: tpu_custom_call.1
= control target key start
LH: loop header
LB: loop body
LE: loop exit
PB: predicated region body
PF: predicated region fallthrough
CT: control target
= control target key end

     0   :  { %s542_s21 = smov [#allocation6]   ;;  %s543_s22 = smov [#allocation7]   ;;  %s674_s0 = inlined_call_operand.vmem [shape: s32[256], index: 0, kind: input, shape index: {}]   ;;  %s675_s2 = inlined_call_operand.vmem [shape: f32[128,64], index: 2, kind: input, shape index: {}]   ;;  %s676_s3 = inlined_call_operand.vmem [shape: f32[128,64], index: 3, kind: input, shape index: {}]   ;;  %s677_s4 = inlined_call_operand.hbm [shape: f32[1,256], index: 4, kind: output, shape index: {}]   ;;  %s678_s1 = inlined_call_operand.vmem [shape: s32[256], index: 1, kind: input, shape index: {}]  }
   0x1   :  { %s10_s17 = sshll.u32 %s674_s0, 4  ;;  %s15_s20 = sshll.u32 %s678_s1, 4  ;;  %s11_s17 = int_to_ptr.vmem [resolvable:$true] %s10_s17  ;;  %s16_s20 = int_to_ptr.vmem [resolvable:$true] %s15_s20 }
   0x2   :  { %13 = dma.vmem_to_smem %s11_s17, 32, %s542_s21, [#allocation5] }
   0x3   :  { %18 = dma.vmem_to_smem %s16_s20, 32, %s543_s22, [#allocation5] }
   0x4   :  { %512 = dma.done.wait [#allocation5], 64 }
   0x5   :  { %513 = vsyncadd [#allocation5], 4294967232 }
   0x6   :  { %21 = sfence }
   0x7   :  { %22 = vsyncpa [#allocation9], 0 }
   0x8   :  { %24 = vsyncpa [#allocation9 + $0x1], 0  ;;  %s576_s23 = smov 0   ;;  %s578_s24 = smov 0  }
   0x9   :  { %s580_s0 = smov 0  }
   0xa LB: > { %s365_s1 = sadd.s32 4294967295, %s532_s0   ;;  %s593_s25 = sadd.s32 1, %s532_s0   ;;  %s532_s0 = sphi %s580_s0, %s683_s0   ;;  %s528_s24 = sphi %s578_s24, %s682_s24   ;;  %s524_s23 = sphi %s576_s23, %s681_s23  }
   0xb   : > { %s33_s26 = ssub.s32 %s532_s0, %s593_s25  ;;  %s36_s27 = sadd.s32 1, %s528_s24 }
   0xc   : > { %p34_p0 = scmp.eq.s32.totalorder %s33_s26, 0  ;;  %p366_p1 = scmp.ne.s32.totalorder %s33_s26, 0 }
   0xd   : > { %p40_p2 = scmp.eq.s32.totalorder %s532_s0, 1  ;;  %p45_p3 = scmp.ne.s32.totalorder %s528_s24, %s524_s23 }
   0xe   : > { %s602_s28 = scalar_select %p34_p0, %s528_s24, %s36_s27  }
   0xf   : > { %p604_p4 = por %p366_p1, %p40_p2  ;;  %p46_p5 = scmp.eq.s32.totalorder %s365_s1, 1 }
  0x10   : > { %p367_p7 = scmp.ge.s32.totalorder %s532_s0, 2 }
  0x11   : > { %p608_p6 = por %p46_p5, %p45_p3  ;;  %s60_s5 = sand.u32 (!%p367_p7), 1, %s528_s24  }
  0x12   : > { %55 = sbr.rel (%p367_p7) target bundleno = 245 (0xf5), region = 12  ;;  %s368_s6 = sshll.u32 (!%p367_p7), %s532_s0, 7 }
  0x13   : > { %s617_s7 = scalar_lea.vmem (!%p367_p7), [#allocation8], %s60_s5  ;;  %s534_s8 = smov (!%p367_p7), 0  }
  0x17 LB: >> { %s69_s9 = sadd.s32 %s536_s8, %s368_s6  ;;  %s73_s15 = scalar_lea.vmem [#allocation2], %s536_s8  ;;  %s536_s8 = sphi %s534_s8, %s68_s8  }
  0x18   : >> { %s70_s10 = sld [smem:[#allocation6 + %s69_s9]] }
  0x19   : >> { %s71_s11 = sld [smem:[#allocation7 + %s69_s9]] }
  0x1e   : >> { %s72_s14 = scalar_lea.vmem %s675_s2, %s70_s10 }
  0x1f   : >> { %v88_v0 = vld [vmem:[%s72_s14] sm:$0x1] }
  0x20   : >> { %89 = vst [vmem:[%s73_s15] sm:$0x1] %v88_v0 }
  0x21   : >> { %107 = vsyncadd [#allocation4], 16  ;;  %s108_s18 = scalar_lea.vmem %s676_s3, %s71_s11  ;;  %s109_s19 = scalar_lea.vmem [#allocation3], %s536_s8 }
  0x22   : >> { %v125_v1 = vld [vmem:[%s108_s18] sm:$0x1] }
  0x23   : >> { %126 = vst [vmem:[%s109_s19] sm:$0x1] %v125_v1 }
  0x24   : >> { %144 = vsyncadd [#allocation4 + $0x1], 16  ;;  %s68_s8 = sadd.s32 1, %s536_s8  }
  0x25   : >> { %p65_p8 = scmp.ge.s32.totalorder %s68_s8, 128  }
  0x26   : > { %s538_s20 = smov (%p65_p8), 0  }
  0x27   : > { %67 = sbr.rel (!%p65_p8) target bundleno = 23 (0x17), region = 133 }
  0x2c LB: >> { %514 = dma.done.wait [#allocation4], 16  ;;  %s540_s20 = sphi %s538_s20, %s150_s20  }
  0x2d   : >> { %515 = vsyncadd [#allocation4], 4294967280 }
  0x2e   : >> { %516 = dma.done.wait [#allocation4 + $0x1], 16 }
  0x2f   : >> { %517 = vsyncadd [#allocation4 + $0x1], 4294967280  ;;  %s150_s20 = sadd.s32 1, %s540_s20  }
  0x30   : >> { %p147_p9 = scmp.ge.s32.totalorder %s150_s20, 128  }
  0x31   : > { %v172_v2 = vld [vmem:[#allocation2 + $0x78] sm:$0xff] (%p147_p9)  ;;  %vm205_vm0 = vcmask (%p147_p9), 523264   ;;  %v171_v4 = vld [vmem:[#allocation2 + $0x70] sm:$0xff] (%p147_p9)  ;;  %v170_v8 = vld [vmem:[#allocation2 + $0x68] sm:$0xff] (%p147_p9)  ;;  %v544_v50 = vmov (%p147_p9), 1.0   ;;  %s287_s1 = scalar_lea.hbm (%p147_p9), %s677_s4, %s532_s0  ;;  %s289_s26 = sshll.u32 (%p147_p9), %s617_s7, 4  ;;  %s290_s26 = int_to_ptr.vmem [resolvable:$true] %s289_s26 }
  0x32   : > { %149 = sbr.rel (!%p147_p9) target bundleno = 44 (0x2c), region = 144  ;;  %v188_v3 = vld [vmem:[#allocation3 + $0x78] sm:$0xff] (%p147_p9)  ;;  %v187_v6 = vld [vmem:[#allocation3 + $0x70] sm:$0xff] (%p147_p9)  ;;  %v186_v9 = vld [vmem:[#allocation3 + $0x68] sm:$0xff] (%p147_p9)  ;;  %s291_s27 = sshll.u32 (%p147_p9), %s287_s1, 4  ;;  %s292_s27 = int_to_ptr.hbm [resolvable:$true] %s291_s27 }
  0x33   : > { %v204_v5 = vmul.f32 (%p147_p9), %v188_v3, %v172_v2  ;;  %v203_v7 = vmul.f32 (%p147_p9), %v187_v6, %v171_v4  ;;  %v202_v10 = vmul.f32 (%p147_p9), %v186_v9, %v170_v8  ;;  %v169_v11 = vld [vmem:[#allocation2 + $0x60] sm:$0xff] (%p147_p9)  ;;  %v168_v14 = vld [vmem:[#allocation2 + $0x58] sm:$0xff] (%p147_p9)  ;;  %v167_v17 = vld [vmem:[#allocation2 + $0x50] sm:$0xff] (%p147_p9)  ;;  %s279_s6 = scalar_lea.sflag (%p147_p9), [#allocation9], %s60_s5  ;;  %s478_s8 = sshra.s32 (%p147_p9), %s292_s27, 4  ;;  %s479_s8 = int_to_ptr.hbm [resolvable:$true] %s478_s8 }
  0x34   : > { %v185_v12 = vld [vmem:[#allocation3 + $0x60] sm:$0xff] (%p147_p9)  ;;  %v184_v15 = vld [vmem:[#allocation3 + $0x58] sm:$0xff] (%p147_p9)  ;;  %v183_v18 = vld [vmem:[#allocation3 + $0x50] sm:$0xff] (%p147_p9)  ;;  %s480_s9 = scalar_lea.hbm (%p147_p9), %s479_s8, 1  ;;  %s484_s12 = scalar_lea.hbm (%p147_p9), %s677_s4, 2 }
  0x35   : > { %369 = vmatpush.xpose.msk.msra.mxu0 (%p147_p9), %vm205_vm0, %v204_v5  ;;  %v201_v13 = vmul.f32 (%p147_p9), %v185_v12, %v169_v11  ;;  %v200_v16 = vmul.f32 (%p147_p9), %v184_v15, %v168_v14  ;;  %v199_v19 = vmul.f32 (%p147_p9), %v183_v18, %v167_v17  ;;  %v166_v20 = vld [vmem:[#allocation2 + $0x48] sm:$0xff] (%p147_p9)  ;;  %v165_v23 = vld [vmem:[#allocation2 + $0x40] sm:$0xff] (%p147_p9)  ;;  %v164_v26 = vld [vmem:[#allocation2 + $0x38] sm:$0xff] (%p147_p9)  ;;  %p481_p10 = scmp.ne.s32.totalorder (%p147_p9), %s479_s8, %s480_s9  ;;  %p485_p13 = scmp.lt.s32.totalorder (%p147_p9), %s479_s8, %s677_s4 }
  0x36   : > { %v182_v21 = vld [vmem:[#allocation3 + $0x48] sm:$0xff] (%p147_p9)  ;;  %v181_v24 = vld [vmem:[#allocation3 + $0x40] sm:$0xff] (%p147_p9)  ;;  %v180_v27 = vld [vmem:[#allocation3 + $0x38] sm:$0xff] (%p147_p9)  ;;  %p486_p0 = scmp.lt.s32.totalorder (%p147_p9), %s484_s12, %s480_s9 }
  0x37   : > { %v198_v22 = vmul.f32 %v182_v21, %v166_v20  ;;  %v197_v25 = vmul.f32 %v181_v24, %v165_v23  ;;  %v196_v28 = vmul.f32 %v180_v27, %v164_v26  ;;  %v163_v29 = vld [vmem:[#allocation2 + $0x30] sm:$0xff]  ;;  %v162_v32 = vld [vmem:[#allocation2 + $0x28] sm:$0xff]  ;;  %v161_v35 = vld [vmem:[#allocation2 + $0x20] sm:$0xff]  ;;  %p482_p11 = pnand %p481_p10, %p604_p4 }
  0x38   : > { %v179_v30 = vld [vmem:[#allocation3 + $0x30] sm:$0xff]  ;;  %v178_v33 = vld [vmem:[#allocation3 + $0x28] sm:$0xff]  ;;  %v177_v36 = vld [vmem:[#allocation3 + $0x20] sm:$0xff]  ;;  %p487_p1 = por %p486_p0, %p485_p13 }
  0x39   : > { %370 = vmatpush.xpose.msk.msra.mxu0 %vm205_vm0, %v203_v7  ;;  %v195_v31 = vmul.f32 %v179_v30, %v163_v29  ;;  %v194_v34 = vmul.f32 %v178_v33, %v162_v32  ;;  %v193_v37 = vmul.f32 %v177_v36, %v161_v35  ;;  %v160_v38 = vld [vmem:[#allocation2 + $0x18] sm:$0xff]  ;;  %v159_v41 = vld [vmem:[#allocation2 + $0x10] sm:$0xff]  ;;  %v158_v44 = vld [vmem:[#allocation2 + $0x8] sm:$0xff]  ;;  %p483_p12 = pneg %p482_p11 }
  0x3a   : > { %v176_v39 = vld [vmem:[#allocation3 + $0x18] sm:$0xff]  ;;  %v175_v42 = vld [vmem:[#allocation3 + $0x10] sm:$0xff]  ;;  %v174_v45 = vld [vmem:[#allocation3 + $0x8] sm:$0xff] }
  0x3b   : > { %v192_v40 = vmul.f32 %v176_v39, %v160_v38  ;;  %v191_v43 = vmul.f32 %v175_v42, %v159_v41  ;;  %v190_v46 = vmul.f32 %v174_v45, %v158_v44  ;;  %v157_v47 = vld [vmem:[#allocation2] sm:$0xff]  ;;  %p488_p2 = pnand %p487_p1, %p483_p12 }
  0x3c   : > { %v173_v48 = vld [vmem:[#allocation3] sm:$0xff] }
  0x3d   : > { %371 = vmatpush.xpose.msk.msra.mxu0 %vm205_vm0, %v202_v10  ;;  %v189_v49 = vmul.f32 %v173_v48, %v157_v47 }
  0x41   : > { %372 = vmatpush.xpose.msk.msra.mxu0 %vm205_vm0, %v201_v13 }
  0x45   : > { %373 = vmatpush.xpose.msk.msra.mxu0 %vm205_vm0, %v200_v16 }
  0x49   : > { %374 = vmatpush.xpose.msk.msra.mxu0 %vm205_vm0, %v199_v19 }
  0x4d   : > { %375 = vmatpush.xpose.msk.msra.mxu0 %vm205_vm0, %v198_v22 }
  0x51   : > { %376 = vmatpush.xpose.msk.msra.mxu0 %vm205_vm0, %v197_v25 }
  0x55   : > { %377 = vmatpush.xpose.msk.msra.mxu0 %vm205_vm0, %v196_v28 }
  0x59   : > { %378 = vmatpush.xpose.msk.msra.mxu0 %vm205_vm0, %v195_v31 }
  0x5d   : > { %379 = vmatpush.xpose.msk.msra.mxu0 %vm205_vm0, %v194_v34 }
  0x61   : > { %380 = vmatpush.xpose.msk.msra.mxu0 %vm205_vm0, %v193_v37 }
  0x65   : > { %381 = vmatpush.xpose.msk.msra.mxu0 %vm205_vm0, %v192_v40 }
  0x69   : > { %382 = vmatpush.xpose.msk.msra.mxu0 %vm205_vm0, %v191_v43 }
  0x6d   : > { %383 = vmatpush.xpose.msk.msra.mxu0 %vm205_vm0, %v190_v46 }
  0x71   : > { %384 = vmatpush.xpose.msk.msra.mxu0 %vm205_vm0, %v189_v49 }
  0x74   : > { %385 = vmatmul.msk.f32.vlgmr.msra.gmra.mxu0 %vm205_vm0, %v544_v50 }
  0xf1   : > { %v274_v51 = vpop.f32.mrf.mxu0 }
  0xf2   : > { %277 = vst [vmem:[%s617_s7] sm:$0x1] %v274_v51 }
  0xf3   : > { %491 = shalt.err (!%p488_p2)
}
  0xf4   : > { %390 = dma.vmem_to_hbm [thread:$0]  (%p604_p4), %s290_s26, 16, %s292_s27, %s279_s6  }
  0xf5 PF: > { %p396_p3 = scmp.ge.s32.totalorder %s532_s0, 1  ;;  %s303_s5 = sand.u32 1, %s524_s23  }
  0xf6   : > { %s304_s7 = scalar_lea.sflag [#allocation9], %s303_s5 }
  0xf7   : > { %p393_p5 = pnand %p396_p3, %p608_p6 }
  0xf9   : > { %p394_p7 = pneg %p393_p5 }
  0xfb   : > { %519 = dma.done.wait (%p394_p7), %s304_s7, 16  }
  0xfc   : > { %521 = vsyncadd (%p394_p7), %s304_s7, 4294967280  ;;  %p27_p8 = scmp.ge.s32.totalorder %s593_s25, 3   ;;  %s681_s23 = smov %s528_s24 }
  0xfd   : > { %s682_s24 = smov %s602_s28  ;;  %s683_s0 = smov %s593_s25 }
  0xfe   :  { %29 = sbr.rel (!%p27_p8) target bundleno = 10 (0xa), region = 155 }
 0x103   :  { %309 = vsyncpa [#allocation9], 1 }
 0x104   :  { %311 = vsyncpa [#allocation9 + $0x1], 1 }
 0x105   :  { %312 = vsyncmov [#allocation4] }
 0x108   :  { %s313_s0 = vpop.sfrf %312 }
 0x109   :  { %p388_p4 = scmp.ne.s32.totalorder %s313_s0, 0 }
 0x10b   :  { %317 = shalt.err (%p388_p4)  }
 0x10c   :  { %319 = vsyncmov [#allocation4 + $0x1] }
 0x10f   :  { %s320_s29 = vpop.sfrf %319 }
 0x110   :  { %p389_p6 = scmp.ne.s32.totalorder %s320_s29, 0 }
 0x112   :  { %324 = shalt.err (%p389_p6)  }

</bundles_post_ra>
